<compile_context>
chip_gen: v5e
topology: v5e:2x2
jax: 0.10.0
libtpu: 0.0.40
codegen_flags: <defaults>
</compile_context>

<pallas_src>
import jax
import jax.numpy as jnp
from jax.experimental import pallas as pl
from jax.experimental.pallas import tpu as pltpu


# ---------------------------------------------------------------------------
# Fused Pallas kernel: encoder MLP + reparameterize + decoder MLP (one batch tile)
# ---------------------------------------------------------------------------

def vae_fused_kernel(x_ref, w1_ref, b1_ref, wstat_ref, bstat_ref, eps_ref,
                     wd1_ref, bd1_ref, wd2_ref, bd2_ref,
                     recon_ref, stats_ref):
    """x -> h -> (mu|logvar) -> z = mu + std*eps -> decoder -> sigmoid recon.

    Outputs (per batch tile):
      recon_ref : [TILE_B, D_IN]     float32, sigmoid reconstruction (lane-dense).
      stats_ref : [TILE_B, >=4*L]    float32, packed [mu | logvar | std | z | 0-pad].
    """
    L = eps_ref.shape[1]

    # ---- encoder -----------------------------------------------------------
    x = x_ref[...].astype(jnp.bfloat16)
    h = jnp.dot(x, w1_ref[...], preferred_element_type=jnp.float32) + b1_ref[...]
    h = jnp.maximum(h, 0.0)                                        # ReLU (f32)

    # single fused latent projection: [TILE_B, 2L] = h @ [H, 2L]  (== [mu | logvar])
    stats = jnp.dot(h.astype(jnp.bfloat16), wstat_ref[...],
                    preferred_element_type=jnp.float32) + bstat_ref[...]
    mu = stats[:, :L]
    logvar = stats[:, L:]

    # ---- reparameterize (Normal(mu, exp(0.5*logvar)).rsample()) ------------
    std = jnp.exp(0.5 * logvar)                                    # f32 EUP exp
    z = mu + std * eps_ref[...]

    # ---- decoder ------------------------------------------------------------
    hd = jnp.dot(z.astype(jnp.bfloat16), wd1_ref[...],
                 preferred_element_type=jnp.float32) + bd1_ref[...]
    hd = jnp.maximum(hd, 0.0)
    logits = jnp.dot(hd.astype(jnp.bfloat16), wd2_ref[...],
                     preferred_element_type=jnp.float32) + bd2_ref[...]

    recon_ref[...] = jax.nn.sigmoid(logits)

    # `stats` is already contiguous [mu | logvar]; append std, z and zero-pad to the
    # 128-lane-dense output width (one unmasked full-width store).
    packed = jnp.concatenate([stats, std, z], axis=-1)
    pad_w = stats_ref.shape[1] - packed.shape[1]           # static at trace time
    if pad_w > 0:
        packed = jnp.concatenate(
            [packed, jnp.zeros((packed.shape[0], pad_w), jnp.float32)], axis=-1)
    stats_ref[...] = packed


# ---------------------------------------------------------------------------
# Wrapper
# ---------------------------------------------------------------------------

def normal_vae_forward(x_nchw, params, eps, *, tile_b=8):
    """Mirrors NormalVAE.forward(x_src) -> (decoder(z_sample), q_normal).

    Returns (x_recon, (mu, std, logvar), z). For large batches raise tile_b
    (e.g. 512-1024 on v6e, <=1024 on v7x's 64 MiB VMEM) — only the batch axis
    is tiled, weights stay VMEM-resident.
    """
    # TODO(synk): torch.distributions.Normal instance itself is not translatable;
    # we return its sufficient statistics (loc=mu, scale=std) plus logvar (for KL).
    B, C, H, W = x_nchw.shape
    D_IN = C * H * W
    L = eps.shape[1]
    D_HID = params["w1"].shape[1]

    # Flatten only; no dtype cast here (kernel casts at MXU inputs; a bf16 producer
    # can feed bf16 x directly to halve input bytes on v5e).
    x_flat = x_nchw.reshape(B, D_IN)

    # Pad batch up to a multiple of the tile; padded rows are sliced off below.
    B_pad = ((B + tile_b - 1) // tile_b) * tile_b
    if B_pad != B:
        x_flat = jnp.pad(x_flat, ((0, B_pad - B), (0, 0)))
        eps = jnp.pad(eps, ((0, B_pad - B), (0, 0)))
    num_tiles = B_pad // tile_b

    stats_w = ((4 * L + 127) // 128) * 128   # lane-dense packed-stats width

    flops = 2 * B_pad * (D_IN * D_HID + D_HID * 2 * L + L * D_HID + D_HID * D_IN)
    transcendentals = B_pad * (L + D_IN)     # exp for std + exp inside sigmoid
    bytes_accessed = (
        sum(int(v.size) * v.dtype.itemsize for v in params.values())
        + int(x_flat.size) * x_flat.dtype.itemsize
        + int(eps.size) * eps.dtype.itemsize
        + B_pad * D_IN * 4 + B_pad * stats_w * 4)

    # Batch-streamed blocks (pipelined) vs. VMEM-resident weight blocks
    # (block index constant across the grid -> Pallas skips re-DMA).
    def batch_spec(width):
        return pl.BlockSpec((tile_b, width), lambda i: (i, 0))

    def resident(arr):
        return pl.BlockSpec(arr.shape, lambda i: (0, 0))

    recon_flat, stats = pl.pallas_call(
        vae_fused_kernel,
        grid=(num_tiles,),
        in_specs=[
            batch_spec(D_IN),                                    # x
            resident(params["w1"]), resident(params["b1"]),      # encoder
            resident(params["wstat"]), resident(params["bstat"]),
            batch_spec(L),                                       # eps
            resident(params["wd1"]), resident(params["bd1"]),    # decoder
            resident(params["wd2"]), resident(params["bd2"]),
        ],
        out_specs=(
            batch_spec(D_IN),      # reconstruction (1024-lane-dense)
            batch_spec(stats_w),   # packed [mu|logvar|std|z|pad]
        ),
        out_shape=(
            jax.ShapeDtypeStruct((B_pad, D_IN), jnp.float32),
            jax.ShapeDtypeStruct((B_pad, stats_w), jnp.float32),
        ),
        compiler_params=pltpu.CompilerParams(
            dimension_semantics=("parallel",),   # v7x: shard batch tiles over 2 TCs
            vmem_limit_bytes=32 * 1024 * 1024,   # safe on v5e/v6e/v7x
        ),
        cost_estimate=pl.CostEstimate(
            flops=flops,
            transcendentals=transcendentals,
            bytes_accessed=bytes_accessed,
        ),
    )(x_flat, params["w1"], params["b1"], params["wstat"], params["bstat"], eps,
      params["wd1"], params["bd1"], params["wd2"], params["bd2"])

    mu = stats[:B, 0 * L:1 * L]
    logvar = stats[:B, 1 * L:2 * L]
    std = stats[:B, 2 * L:3 * L]
    z = stats[:B, 3 * L:4 * L]

    x_recon = recon_flat[:B].reshape(B, C, H, W)
    return x_recon, (mu, std, logvar), z


# ---------------------------------------------------------------------------
# Deterministic parameter init
# ---------------------------------------------------------------------------

def init_params(key, d_in, d_hidden, d_latent):
    ks = jax.random.split(key, 6)
    s = 0.05
    # Initialize in f32, then pack/cast: weights -> bf16 for DMA/MXU, biases -> f32.
    w1 = s * jax.random.normal(ks[0], (d_in, d_hidden), jnp.float32)
    wmu = s * jax.random.normal(ks[1], (d_hidden, d_latent), jnp.float32)
    wlv = s * jax.random.normal(ks[2], (d_hidden, d_latent), jnp.float32)
    wd1 = s * jax.random.normal(ks[3], (d_latent, d_hidden), jnp.float32)
    wd2 = s * jax.random.normal(ks[4], (d_hidden, d_in), jnp.float32)
    return {
        # encoder
        "w1":    w1.astype(jnp.bfloat16),
        "b1":    jnp.zeros((1, d_hidden), jnp.float32),
        # fused [mu | logvar] projection
        "wstat": jnp.concatenate([wmu, wlv], axis=1).astype(jnp.bfloat16),
        "bstat": jnp.zeros((1, 2 * d_latent), jnp.float32),
        # decoder
        "wd1":   wd1.astype(jnp.bfloat16),
        "bd1":   jnp.zeros((1, d_hidden), jnp.float32),
        "wd2":   wd2.astype(jnp.bfloat16),
        "bd2":   jnp.zeros((1, d_in), jnp.float32),
    }


# ---------------------------------------------------------------------------
# Main
# ---------------------------------------------------------------------------

if __name__ == "__main__":
    # Small shapes; B=16 with TILE_B=8 exercises a 2-step pipelined batch grid.
    B, C, H, W = 16, 4, 16, 16
    D_IN = C * H * W       # 1024
    D_HIDDEN = 32
    D_LATENT = 16

    key = jax.random.PRNGKey(0)
    k_x, k_eps, k_p = jax.random.split(key, 3)

    x = jax.random.uniform(k_x, (B, C, H, W), jnp.float32)          # "image" input
    eps = jax.random.normal(k_eps, (B, D_LATENT), jnp.float32)      # rsample noise
    params = init_params(k_p, D_IN, D_HIDDEN, D_LATENT)

    x_recon, (mu, scale, logvar), z = normal_vae_forward(x, params, eps, tile_b=8)
    jax.block_until_ready((x_recon, mu, scale, logvar, z))

    assert x_recon.shape == (B, C, H, W)
    assert mu.shape == (B, D_LATENT) and scale.shape == (B, D_LATENT)
    assert logvar.shape == (B, D_LATENT) and z.shape == (B, D_LATENT)
    assert bool(jnp.all(jnp.isfinite(x_recon)))
    assert bool(jnp.all(scale > 0.0))
    assert bool(jnp.all((x_recon >= 0.0) & (x_recon <= 1.0)))
    # scale must equal exp(0.5 * logvar) (reparameterization consistency)
    assert bool(jnp.allclose(scale, jnp.exp(0.5 * logvar), rtol=1e-5, atol=1e-6))

    print("KERNEL_OK")
</pallas_src>

<mosaic_0001>
module attributes {stable_mosaic.version = 11 : i64} {
  func.func @vae_fused_kernel(%arg0: i32, %arg1: memref<8x1024xf32, #tpu.memory_space<vmem>>, %arg2: memref<1024x32xbf16, #tpu.memory_space<vmem>>, %arg3: memref<1x32xf32, #tpu.memory_space<vmem>>, %arg4: memref<32x32xbf16, #tpu.memory_space<vmem>>, %arg5: memref<1x32xf32, #tpu.memory_space<vmem>>, %arg6: memref<8x16xf32, #tpu.memory_space<vmem>>, %arg7: memref<16x32xbf16, #tpu.memory_space<vmem>>, %arg8: memref<1x32xf32, #tpu.memory_space<vmem>>, %arg9: memref<32x1024xbf16, #tpu.memory_space<vmem>>, %arg10: memref<1x1024xf32, #tpu.memory_space<vmem>>, %arg11: memref<8x1024xf32, #tpu.memory_space<vmem>>, %arg12: memref<8x128xf32, #tpu.memory_space<vmem>>) attributes {dimension_semantics = [#tpu.dimension_semantics<parallel>], iteration_bounds = array<i64: 2>, scalar_prefetch = 0 : i64, scratch_operands = 0 : i64, tpu.core_type = #tpu.core_type<tc>, window_params = [{transform_indices = @transform_0, window_bounds = array<i64: 8, 1024>}, {pipeline_mode = #tpu.pipeline_mode<synchronous>, transform_indices = @transform_1, window_bounds = array<i64: 1024, 32>}, {pipeline_mode = #tpu.pipeline_mode<synchronous>, transform_indices = @transform_2, window_bounds = array<i64: 1, 32>}, {pipeline_mode = #tpu.pipeline_mode<synchronous>, transform_indices = @transform_3, window_bounds = array<i64: 32, 32>}, {pipeline_mode = #tpu.pipeline_mode<synchronous>, transform_indices = @transform_4, window_bounds = array<i64: 1, 32>}, {transform_indices = @transform_5, window_bounds = array<i64: 8, 16>}, {pipeline_mode = #tpu.pipeline_mode<synchronous>, transform_indices = @transform_6, window_bounds = array<i64: 16, 32>}, {pipeline_mode = #tpu.pipeline_mode<synchronous>, transform_indices = @transform_7, window_bounds = array<i64: 1, 32>}, {pipeline_mode = #tpu.pipeline_mode<synchronous>, transform_indices = @transform_8, window_bounds = array<i64: 32, 1024>}, {pipeline_mode = #tpu.pipeline_mode<synchronous>, transform_indices = @transform_9, window_bounds = array<i64: 1, 1024>}, {transform_indices = @transform_10, window_bounds = array<i64: 8, 1024>}, {transform_indices = @transform_11, window_bounds = array<i64: 8, 128>}]} {
    %c0 = arith.constant 0 : index
    %c0_0 = arith.constant 0 : index
    %0 = vector.load %arg1[%c0, %c0_0] : memref<8x1024xf32, #tpu.memory_space<vmem>>, vector<8x1024xf32>
    %1 = arith.truncf %0 : vector<8x1024xf32> to vector<8x1024xbf16>
    %c0_1 = arith.constant 0 : index
    %c0_2 = arith.constant 0 : index
    %2 = vector.load %arg2[%c0_1, %c0_2] : memref<1024x32xbf16, #tpu.memory_space<vmem>>, vector<1024x32xbf16>
    %cst = arith.constant dense<0.000000e+00> : vector<8x32xf32>
    %3 = tpu.matmul %1, %2, %cst {dimension_numbers = #tpu.dot_dimension_numbers<[1], [0], [0], [1], [0, 0, 1, 1], [], []>} : vector<8x1024xbf16>, vector<1024x32xbf16>, vector<8x32xf32> -> vector<8x32xf32>
    %c0_3 = arith.constant 0 : index
    %c0_4 = arith.constant 0 : index
    %4 = vector.load %arg3[%c0_3, %c0_4] : memref<1x32xf32, #tpu.memory_space<vmem>>, vector<1x32xf32>
    %5 = vector.broadcast %4 : vector<1x32xf32> to vector<8x32xf32>
    %6 = arith.addf %3, %5 : vector<8x32xf32>
    %cst_5 = arith.constant 0.000000e+00 : f32
    %7 = vector.broadcast %cst_5 : f32 to vector<8x32xf32>
    %8 = arith.maximumf %6, %7 : vector<8x32xf32>
    %9 = arith.truncf %8 : vector<8x32xf32> to vector<8x32xbf16>
    %c0_6 = arith.constant 0 : index
    %c0_7 = arith.constant 0 : index
    %10 = vector.load %arg4[%c0_6, %c0_7] : memref<32x32xbf16, #tpu.memory_space<vmem>>, vector<32x32xbf16>
    %cst_8 = arith.constant dense<0.000000e+00> : vector<8x32xf32>
    %11 = tpu.matmul %9, %10, %cst_8 {dimension_numbers = #tpu.dot_dimension_numbers<[1], [0], [0], [1], [0, 0, 1, 1], [], []>} : vector<8x32xbf16>, vector<32x32xbf16>, vector<8x32xf32> -> vector<8x32xf32>
    %c0_9 = arith.constant 0 : index
    %c0_10 = arith.constant 0 : index
    %12 = vector.load %arg5[%c0_9, %c0_10] : memref<1x32xf32, #tpu.memory_space<vmem>>, vector<1x32xf32>
    %13 = vector.broadcast %12 : vector<1x32xf32> to vector<8x32xf32>
    %14 = arith.addf %11, %13 : vector<8x32xf32>
    %15 = vector.extract_strided_slice %14 {offsets = [0, 0], sizes = [8, 16], strides = [1, 1]} : vector<8x32xf32> to vector<8x16xf32>
    %16 = vector.extract_strided_slice %14 {offsets = [0, 16], sizes = [8, 16], strides = [1, 1]} : vector<8x32xf32> to vector<8x16xf32>
    %cst_11 = arith.constant 5.000000e-01 : f32
    %17 = vector.broadcast %cst_11 : f32 to vector<8x16xf32>
    %18 = arith.mulf %17, %16 : vector<8x16xf32>
    %19 = math.exp %18 : vector<8x16xf32>
    %c0_12 = arith.constant 0 : index
    %c0_13 = arith.constant 0 : index
    %20 = vector.load %arg6[%c0_12, %c0_13] : memref<8x16xf32, #tpu.memory_space<vmem>>, vector<8x16xf32>
    %21 = arith.mulf %19, %20 : vector<8x16xf32>
    %22 = arith.addf %15, %21 : vector<8x16xf32>
    %23 = arith.truncf %22 : vector<8x16xf32> to vector<8x16xbf16>
    %c0_14 = arith.constant 0 : index
    %c0_15 = arith.constant 0 : index
    %24 = vector.load %arg7[%c0_14, %c0_15] : memref<16x32xbf16, #tpu.memory_space<vmem>>, vector<16x32xbf16>
    %cst_16 = arith.constant dense<0.000000e+00> : vector<8x32xf32>
    %25 = tpu.matmul %23, %24, %cst_16 {dimension_numbers = #tpu.dot_dimension_numbers<[1], [0], [0], [1], [0, 0, 1, 1], [], []>} : vector<8x16xbf16>, vector<16x32xbf16>, vector<8x32xf32> -> vector<8x32xf32>
    %c0_17 = arith.constant 0 : index
    %c0_18 = arith.constant 0 : index
    %26 = vector.load %arg8[%c0_17, %c0_18] : memref<1x32xf32, #tpu.memory_space<vmem>>, vector<1x32xf32>
    %27 = vector.broadcast %26 : vector<1x32xf32> to vector<8x32xf32>
    %28 = arith.addf %25, %27 : vector<8x32xf32>
    %cst_19 = arith.constant 0.000000e+00 : f32
    %29 = vector.broadcast %cst_19 : f32 to vector<8x32xf32>
    %30 = arith.maximumf %28, %29 : vector<8x32xf32>
    %31 = arith.truncf %30 : vector<8x32xf32> to vector<8x32xbf16>
    %c0_20 = arith.constant 0 : index
    %c0_21 = arith.constant 0 : index
    %32 = vector.load %arg9[%c0_20, %c0_21] : memref<32x1024xbf16, #tpu.memory_space<vmem>>, vector<32x1024xbf16>
    %cst_22 = arith.constant dense<0.000000e+00> : vector<8x1024xf32>
    %33 = tpu.matmul %31, %32, %cst_22 {dimension_numbers = #tpu.dot_dimension_numbers<[1], [0], [0], [1], [0, 0, 1, 1], [], []>} : vector<8x32xbf16>, vector<32x1024xbf16>, vector<8x1024xf32> -> vector<8x1024xf32>
    %c0_23 = arith.constant 0 : index
    %c0_24 = arith.constant 0 : index
    %34 = vector.load %arg10[%c0_23, %c0_24] : memref<1x1024xf32, #tpu.memory_space<vmem>>, vector<1x1024xf32>
    %35 = vector.broadcast %34 : vector<1x1024xf32> to vector<8x1024xf32>
    %36 = arith.addf %33, %35 : vector<8x1024xf32>
    %37 = arith.negf %36 : vector<8x1024xf32>
    %38 = math.exp %37 : vector<8x1024xf32>
    %cst_25 = arith.constant 1.000000e+00 : f32
    %39 = vector.broadcast %cst_25 : f32 to vector<8x1024xf32>
    %40 = arith.addf %39, %38 : vector<8x1024xf32>
    %41 = arith.divf %39, %40 : vector<8x1024xf32>
    %c0_26 = arith.constant 0 : index
    %c0_27 = arith.constant 0 : index
    %42 = vector.load %arg11[%c0_26, %c0_27] : memref<8x1024xf32, #tpu.memory_space<vmem>>, vector<8x1024xf32>
    tpu.vector_store %arg11[%c0_26, %c0_27], %41 {strides = array<i32>} : memref<8x1024xf32, #tpu.memory_space<vmem>>, vector<8x1024xf32>,
    %43 = tpu.concatenate %14, %19, %22 in 1 : vector<8x32xf32>, vector<8x16xf32>, vector<8x16xf32> -> vector<8x64xf32>
    %cst_28 = arith.constant 0.000000e+00 : f32
    %44 = vector.broadcast %cst_28 : f32 to vector<8x64xf32>
    %45 = tpu.concatenate %43, %44 in 1 : vector<8x64xf32>, vector<8x64xf32> -> vector<8x128xf32>
    %c0_29 = arith.constant 0 : index
    %c0_30 = arith.constant 0 : index
    %46 = vector.load %arg12[%c0_29, %c0_30] : memref<8x128xf32, #tpu.memory_space<vmem>>, vector<8x128xf32>
    tpu.vector_store %arg12[%c0_29, %c0_30], %45 {strides = array<i32>} : memref<8x128xf32, #tpu.memory_space<vmem>>, vector<8x128xf32>,
    return
  }
  func.func @transform_0(%arg0: i32) -> (i32, i32) {
    %c0_i32 = arith.constant 0 : i32
    %c0_i32_0 = arith.constant 0 : i32
    return %arg0, %c0_i32 : i32, i32
  }
  func.func @transform_1(%arg0: i32) -> (i32, i32) {
    %c0_i32 = arith.constant 0 : i32
    %c0_i32_0 = arith.constant 0 : i32
    %c0_i32_1 = arith.constant 0 : i32
    return %c0_i32, %c0_i32_0 : i32, i32
  }
  func.func @transform_2(%arg0: i32) -> (i32, i32) {
    %c0_i32 = arith.constant 0 : i32
    %c0_i32_0 = arith.constant 0 : i32
    %c0_i32_1 = arith.constant 0 : i32
    return %c0_i32, %c0_i32_0 : i32, i32
  }
  func.func @transform_3(%arg0: i32) -> (i32, i32) {
    %c0_i32 = arith.constant 0 : i32
    %c0_i32_0 = arith.constant 0 : i32
    %c0_i32_1 = arith.constant 0 : i32
    return %c0_i32, %c0_i32_0 : i32, i32
  }
  func.func @transform_4(%arg0: i32) -> (i32, i32) {
    %c0_i32 = arith.constant 0 : i32
    %c0_i32_0 = arith.constant 0 : i32
    %c0_i32_1 = arith.constant 0 : i32
    return %c0_i32, %c0_i32_0 : i32, i32
  }
  func.func @transform_5(%arg0: i32) -> (i32, i32) {
    %c0_i32 = arith.constant 0 : i32
    %c0_i32_0 = arith.constant 0 : i32
    return %arg0, %c0_i32 : i32, i32
  }
  func.func @transform_6(%arg0: i32) -> (i32, i32) {
    %c0_i32 = arith.constant 0 : i32
    %c0_i32_0 = arith.constant 0 : i32
    %c0_i32_1 = arith.constant 0 : i32
    return %c0_i32, %c0_i32_0 : i32, i32
  }
  func.func @transform_7(%arg0: i32) -> (i32, i32) {
    %c0_i32 = arith.constant 0 : i32
    %c0_i32_0 = arith.constant 0 : i32
    %c0_i32_1 = arith.constant 0 : i32
    return %c0_i32, %c0_i32_0 : i32, i32
  }
  func.func @transform_8(%arg0: i32) -> (i32, i32) {
    %c0_i32 = arith.constant 0 : i32
    %c0_i32_0 = arith.constant 0 : i32
    %c0_i32_1 = arith.constant 0 : i32
    return %c0_i32, %c0_i32_0 : i32, i32
  }
  func.func @transform_9(%arg0: i32) -> (i32, i32) {
    %c0_i32 = arith.constant 0 : i32
    %c0_i32_0 = arith.constant 0 : i32
    %c0_i32_1 = arith.constant 0 : i32
    return %c0_i32, %c0_i32_0 : i32, i32
  }
  func.func @transform_10(%arg0: i32) -> (i32, i32) {
    %c0_i32 = arith.constant 0 : i32
    %c0_i32_0 = arith.constant 0 : i32
    return %arg0, %c0_i32 : i32, i32
  }
  func.func @transform_11(%arg0: i32) -> (i32, i32) {
    %c0_i32 = arith.constant 0 : i32
    %c0_i32_0 = arith.constant 0 : i32
    return %arg0, %c0_i32 : i32, i32
  }
}

</mosaic_0001>

<bundles_post_ra>
// kernel: tpu_custom_call.1
= control target key start
LH: loop header
LB: loop body
LE: loop exit
PB: predicated region body
PF: predicated region fallthrough
CT: control target
= control target key end

     0   :  { %s2892_s0 = inlined_call_operand.vmem [shape: f32[16,1024], index: 0, kind: input, shape index: {}]   ;;  %s2893_s1 = inlined_call_operand.vmem [shape: bf16[1024,32], index: 1, kind: input, shape index: {}]   ;;  %s2894_s2 = inlined_call_operand.vmem [shape: f32[1,32], index: 2, kind: input, shape index: {}]   ;;  %s2895_s3 = inlined_call_operand.vmem [shape: bf16[32,32], index: 3, kind: input, shape index: {}]   ;;  %s2896_s4 = inlined_call_operand.vmem [shape: f32[1,32], index: 4, kind: input, shape index: {}]   ;;  %s2897_s5 = inlined_call_operand.vmem [shape: f32[16,16], index: 5, kind: input, shape index: {}]   ;;  %s2898_s6 = inlined_call_operand.vmem [shape: bf16[16,32], index: 6, kind: input, shape index: {}]   ;;  %s2899_s7 = inlined_call_operand.vmem [shape: f32[1,32], index: 7, kind: input, shape index: {}]   ;;  %s2900_s8 = inlined_call_operand.vmem [shape: bf16[32,1024], index: 8, kind: input, shape index: {}]   ;;  %s2901_s9 = inlined_call_operand.vmem [shape: f32[1,1024], index: 9, kind: input, shape index: {}]   ;;  %s2902_s10 = inlined_call_operand.hbm [shape: f32[16,1024], index: 10, kind: output, shape index: {0}]   ;;  %s2903_s11 = inlined_call_operand.hbm [shape: f32[16,128], index: 11, kind: output, shape index: {1}]  }
   0x1   :  { %2907 = sst [smem:[#allocation11_spill]] %s2892_s0 }
   0x2   :  { %2908 = sst [smem:[#allocation12_spill]] %s2893_s1 }
   0x3   :  { %17 = vsyncpa [#allocation3], 0 }
   0x4   :  { %19 = vsyncpa [#allocation3 + $0x1], 0 }
   0x5   :  { %20 = vsyncpa [#allocation5], 0 }
   0x6   :  { %22 = vsyncpa [#allocation5 + $0x1], 0  ;;  %s2364_s17 = smov 0   ;;  %s2366_s18 = smov 0  }
   0x7   :  { %s2368_s19 = smov 0   ;;  %s2370_s20 = smov 0  }
   0x8 LB: > { %2909 = sst [smem:[#allocation8_spill]] %s2295_s19  ;;  %s2385_s21 = sadd.s32 4294967295, %s2299_s20   ;;  %s2299_s20 = sphi %s2370_s20, %s2924_s20   ;;  %s2295_s19 = sphi %s2368_s19, %s2926_s19   ;;  %s2291_s18 = sphi %s2366_s18, %s2928_s18   ;;  %s2287_s17 = sphi %s2364_s17, %s2927_s17  }
   0x9   : > { %s1670_s22 = sadd.s32 4294967294, %s2299_s20   ;;  %s2389_s23 = sadd.s32 1, %s2299_s20  }
   0xa   : > { %2910 = sst [smem:[#allocation9_spill]] %s2389_s23  ;;  %s255_s24 = sadd.s32 1, %s2295_s19 }
   0xb   : > { %s252_s25 = ssub.s32 %s2299_s20, %s2389_s23  ;;  %p265_p0 = scmp.ne.s32.totalorder %s2295_s19, %s2291_s18 }
   0xc   : > { %p253_p1 = scmp.eq.s32.totalorder %s252_s25, 0  ;;  %p266_p2 = scmp.eq.s32.totalorder %s2385_s21, 1 }
   0xd   : > { %p271_p3 = scmp.ne.s32.totalorder %s2291_s18, %s2287_s17  ;;  %p272_p4 = scmp.eq.s32.totalorder %s1670_s22, 1 }
   0xe   : > { %s2400_s26 = scalar_select %p253_p1, %s2295_s19, %s255_s24  }
   0xf   : > { %p2402_p5 = por %p266_p2, %p265_p0  ;;  %p2406_p6 = por %p272_p4, %p271_p3 }
  0x10   : > { %2911 = sst [smem:[#allocation10_spill]] %s2400_s26  ;;  %p1673_p7 = scmp.ge.s32.totalorder %s2299_s20, 1 }
  0x11   : > { %p355_p8 = scmp.lt.s32.totalorder %s2299_s20, 3 }
  0x13   : > { %p356_p9 = pnand %p1673_p7, %p355_p8 }
  0x14   : > { %s2914_s1 = sld [smem:[#allocation12_spill]] (!%p356_p9)  ;;  %p404_p10 = scmp.lt.s32.totalorder (!%p356_p9), %s2385_s21, 1 }
  0x15   : > { %359 = sbr.rel (%p356_p9) target bundleno = 806 (0x326), region = 60  ;;  %s2915_s0 = sld [smem:[#allocation11_spill]] (!%p356_p9) }
  0x16   : > { %s2301_s14 = smov (!%p356_p9), 16   ;;  %s2303_s16 = smov (!%p356_p9), 48  }
  0x17   : > { %s2033_s12 = sshll.u32 (!%p356_p9), %s2385_s21, 3 }
  0x18   : > { %s1561_s15 = scalar_lea.hbm (!%p356_p9), %s2903_s11, %s2033_s12 }
  0x19   : > { %s1565_s19 = sshll.u32 (!%p356_p9), %s1561_s15, 4  ;;  %s1566_s19 = int_to_ptr.hbm [resolvable:$true] %s1565_s19 }
  0x1a   : > { %v2044_v0 = vld [vmem:[%s2914_s1 + $0x38] sm:$0xff]  ;;  %v2043_v4 = vld [vmem:[%s2914_s1 + $0x30] sm:$0xff]  ;;  %v2042_v8 = vld [vmem:[%s2914_s1 + $0x28] sm:$0xff]  ;;  %s2474_s29 = scalar_select %p404_p10, %s2385_s21, 1  ;;  %vm1072_vm0 = vcmask 261120   ;;  %vm1116_vm1 = vcmask 130048  }
  0x1b   : > { %v2052_v1 = vld [vmem:[%s2914_s1 + $0x78] sm:$0xff]  ;;  %946 = vmatpush.bf16.msra.mxu0 %v2044_v0  ;;  %v2051_v5 = vld [vmem:[%s2914_s1 + $0x70] sm:$0xff]  ;;  %v2050_v9 = vld [vmem:[%s2914_s1 + $0x68] sm:$0xff]  ;;  %vm1525_vm2 = vcmask 392192   ;;  %vm1527_vm3 = vcmask 523264  }
  0x1c   : > { %v2060_v2 = vld [vmem:[%s2914_s1 + $0xb8] sm:$0xff]  ;;  %959 = vmatpush.bf16.msra.mxu1 %v2052_v1  ;;  %v2059_v6 = vld [vmem:[%s2914_s1 + $0xb0] sm:$0xff]  ;;  %v2058_v10 = vld [vmem:[%s2914_s1 + $0xa8] sm:$0xff]  ;;  %s2036_s25 = sshll.u32 %s2474_s29, 6 }
  0x1d   : > { %v2068_v3 = vld [vmem:[%s2914_s1 + $0xf8] sm:$0xff]  ;;  %972 = vmatpush.bf16.msra.mxu2 %v2060_v2  ;;  %v2067_v7 = vld [vmem:[%s2914_s1 + $0xf0] sm:$0xff]  ;;  %v2066_v11 = vld [vmem:[%s2914_s1 + $0xe8] sm:$0xff]  ;;  %s2504_s23 = scalar_lea.vmem %s2915_s0, %s2036_s25  ;;  %s2225_s0 = scalar_lea.hbm %s2903_s11, 16 }
  0x1e   : > { %985 = vmatpush.bf16.msra.mxu3 %v2068_v3  ;;  %v2041_v12 = vld [vmem:[%s2914_s1 + $0x20] sm:$0xff]  ;;  %v2040_v16 = vld [vmem:[%s2914_s1 + $0x18] sm:$0xff]  ;;  %v2039_v20 = vld [vmem:[%s2914_s1 + $0x10] sm:$0xff] }
  0x1f   : > { %947 = vmatpush.bf16.msra.mxu0 %v2043_v4  ;;  %v2049_v13 = vld [vmem:[%s2914_s1 + $0x60] sm:$0xff]  ;;  %v2048_v17 = vld [vmem:[%s2914_s1 + $0x58] sm:$0xff]  ;;  %v2047_v21 = vld [vmem:[%s2914_s1 + $0x50] sm:$0xff] }
  0x20   : > { %960 = vmatpush.bf16.msra.mxu1 %v2051_v5  ;;  %v2057_v14 = vld [vmem:[%s2914_s1 + $0xa0] sm:$0xff]  ;;  %v2056_v18 = vld [vmem:[%s2914_s1 + $0x98] sm:$0xff]  ;;  %v2055_v22 = vld [vmem:[%s2914_s1 + $0x90] sm:$0xff] }
  0x21   : > { %973 = vmatpush.bf16.msra.mxu2 %v2059_v6  ;;  %v2065_v15 = vld [vmem:[%s2914_s1 + $0xe0] sm:$0xff]  ;;  %v2064_v19 = vld [vmem:[%s2914_s1 + $0xd8] sm:$0xff]  ;;  %v2063_v23 = vld [vmem:[%s2914_s1 + $0xd0] sm:$0xff] }
  0x22   : > { %986 = vmatpush.bf16.msra.mxu3 %v2067_v7  ;;  %v2038_v24 = vld [vmem:[%s2914_s1 + $0x8] sm:$0xff]  ;;  %v2037_v28 = vld [vmem:[%s2914_s1] sm:$0xff]  ;;  %v2076_v32 = vld [vmem:[%s2914_s1 + $0x138] sm:$0xff] }
  0x23   : > { %948 = vmatpush.bf16.msra.mxu0 %v2042_v8  ;;  %v2046_v25 = vld [vmem:[%s2914_s1 + $0x48] sm:$0xff]  ;;  %v2045_v29 = vld [vmem:[%s2914_s1 + $0x40] sm:$0xff]  ;;  %v416_v33 = vld [vmem:[%s2504_s23 + $0x10] sm:$0xff] }
  0x24   : > { %961 = vmatpush.bf16.msra.mxu1 %v2050_v9  ;;  %v2054_v26 = vld [vmem:[%s2914_s1 + $0x88] sm:$0xff]  ;;  %v2053_v30 = vld [vmem:[%s2914_s1 + $0x80] sm:$0xff]  ;;  %v2084_v35 = vld [vmem:[%s2914_s1 + $0x178] sm:$0xff]  ;;  %v424_v40 = vpack.c.bf16 %v416_v33, %v416_v33 }
  0x25   : > { %974 = vmatpush.bf16.msra.mxu2 %v2058_v10  ;;  %v2062_v27 = vld [vmem:[%s2914_s1 + $0xc8] sm:$0xff]  ;;  %v2061_v31 = vld [vmem:[%s2914_s1 + $0xc0] sm:$0xff]  ;;  %v417_v36 = vld [vmem:[%s2504_s23 + $0x18] sm:$0xff] }
  0x26   : > { %987 = vmatpush.bf16.msra.mxu3 %v2066_v11  ;;  %v414_v34 = vld [vmem:[%s2504_s23] sm:$0xff]  ;;  %v415_v37 = vld [vmem:[%s2504_s23 + $0x8] sm:$0xff]  ;;  %v2092_v38 = vld [vmem:[%s2914_s1 + $0x1b8] sm:$0xff]  ;;  %v425_v42 = vpack.c.bf16 %v417_v36, %v417_v36 }
  0x27   : > { %949 = vmatpush.bf16.msra.mxu0 %v2041_v12  ;;  %v2100_v39 = vld [vmem:[%s2914_s1 + $0x1f8] sm:$0xff]  ;;  %v422_v41 = vpack.c.bf16 %v414_v34, %v414_v34  ;;  %v423_v43 = vpack.c.bf16 %v415_v37, %v415_v37  ;;  %v2075_v44 = vld [vmem:[%s2914_s1 + $0x130] sm:$0xff]  ;;  %v2074_v48 = vld [vmem:[%s2914_s1 + $0x128] sm:$0xff] }
  0x28   : > { %962 = vmatpush.bf16.msra.mxu1 %v2049_v13  ;;  %v2083_v45 = vld [vmem:[%s2914_s1 + $0x170] sm:$0xff]  ;;  %v2082_v49 = vld [vmem:[%s2914_s1 + $0x168] sm:$0xff]  ;;  %v2073_v52 = vld [vmem:[%s2914_s1 + $0x120] sm:$0xff] }
  0x29   : > { %975 = vmatpush.bf16.msra.mxu2 %v2057_v14  ;;  %v2091_v46 = vld [vmem:[%s2914_s1 + $0x1b0] sm:$0xff]  ;;  %v2090_v50 = vld [vmem:[%s2914_s1 + $0x1a8] sm:$0xff]  ;;  %v2081_v53 = vld [vmem:[%s2914_s1 + $0x160] sm:$0xff] }
  0x2a   : > { %988 = vmatpush.bf16.msra.mxu3 %v2065_v15  ;;  %v2099_v47 = vld [vmem:[%s2914_s1 + $0x1f0] sm:$0xff]  ;;  %v2098_v51 = vld [vmem:[%s2914_s1 + $0x1e8] sm:$0xff]  ;;  %v2089_v54 = vld [vmem:[%s2914_s1 + $0x1a0] sm:$0xff] }
  0x2b   : > { %950 = vmatpush.bf16.msra.mxu0 %v2040_v16  ;;  %v2097_v55 = vld [vmem:[%s2914_s1 + $0x1e0] sm:$0xff]  ;;  %v2072_v56 = vld [vmem:[%s2914_s1 + $0x118] sm:$0xff]  ;;  %v2071_v60 = vld [vmem:[%s2914_s1 + $0x110] sm:$0xff] }
  0x2c   : > { %963 = vmatpush.bf16.msra.mxu1 %v2048_v17  ;;  %v2080_v57 = vld [vmem:[%s2914_s1 + $0x158] sm:$0xff]  ;;  %v2079_v61 = vld [vmem:[%s2914_s1 + $0x150] sm:$0xff]  ;;  %v2070_v0 = vld [vmem:[%s2914_s1 + $0x108] sm:$0xff] }
  0x2d   : > { %976 = vmatpush.bf16.msra.mxu2 %v2056_v18  ;;  %v2088_v58 = vld [vmem:[%s2914_s1 + $0x198] sm:$0xff]  ;;  %v2087_v62 = vld [vmem:[%s2914_s1 + $0x190] sm:$0xff]  ;;  %v2078_v1 = vld [vmem:[%s2914_s1 + $0x148] sm:$0xff] }
  0x2e   : > { %989 = vmatpush.bf16.msra.mxu3 %v2064_v19  ;;  %v2096_v59 = vld [vmem:[%s2914_s1 + $0x1d8] sm:$0xff]  ;;  %v2095_v63 = vld [vmem:[%s2914_s1 + $0x1d0] sm:$0xff]  ;;  %v2086_v2 = vld [vmem:[%s2914_s1 + $0x188] sm:$0xff] }
  0x2f   : > { %951 = vmatpush.bf16.msra.mxu0 %v2039_v20  ;;  %v2094_v3 = vld [vmem:[%s2914_s1 + $0x1c8] sm:$0xff]  ;;  %v2069_v4 = vld [vmem:[%s2914_s1 + $0x100] sm:$0xff]  ;;  %v420_v10 = vld [vmem:[%s2504_s23 + $0x30] sm:$0xff] }
  0x30   : > { %964 = vmatpush.bf16.msra.mxu1 %v2047_v21  ;;  %v2077_v5 = vld [vmem:[%s2914_s1 + $0x140] sm:$0xff]  ;;  %v419_v8 = vld [vmem:[%s2504_s23 + $0x28] sm:$0xff]  ;;  %v421_v11 = vld [vmem:[%s2504_s23 + $0x38] sm:$0xff]  ;;  %v428_v14 = vpack.c.bf16 %v420_v10, %v420_v10 }
  0x31   : > { %977 = vmatpush.bf16.msra.mxu2 %v2055_v22  ;;  %v2085_v6 = vld [vmem:[%s2914_s1 + $0x180] sm:$0xff]  ;;  %v427_v13 = vpack.c.bf16 %v419_v8, %v419_v8  ;;  %v429_v15 = vpack.c.bf16 %v421_v11, %v421_v11  ;;  %v2102_v16 = vld [vmem:[%s2895_s3 + $0x8] sm:$0xff] }
  0x32   : > { %990 = vmatpush.bf16.msra.mxu3 %v2063_v23  ;;  %v418_v7 = vld [vmem:[%s2504_s23 + $0x20] sm:$0xff]  ;;  %s1678_s23 = sshll.u32 %s2474_s29, 3 }
  0x33   : > { %952 = vmatpush.bf16.msra.mxu0 %v2038_v24  ;;  %v2093_v9 = vld [vmem:[%s2914_s1 + $0x1c0] sm:$0xff]  ;;  %v426_v12 = vpack.c.bf16 %v418_v7, %v418_v7  ;;  %s412_s30 = scalar_lea.vmem %s2897_s5, %s1678_s23  ;;  %s2302_s23 = smov 112  }
  0x34   : > { %965 = vmatpush.bf16.msra.mxu1 %v2046_v25  ;;  %v2101_v22 = vld [vmem:[%s2895_s3] sm:$0xff] }
  0x35   : > { %978 = vmatpush.bf16.msra.mxu2 %v2054_v26  ;;  %v2168_v24 = vld [vmem:[%s2894_s2] ss:$0 sm:$0xff]  ;;  %v1953_v10 = vld [vmem:[%s2900_s8 + $0x20] sm:$0xf0] }
  0x36   : > { %991 = vmatpush.bf16.msra.mxu3 %v2062_v27  ;;  %v1092_v25 = vld [vmem:[%s412_s30] sm:$0xff] }
  0x37   : > { %953 = vmatpush.bf16.msra.mxu0 %v2037_v28  ;;  %1094 = vrot.lane.b32.xlu0 %v1092_v25, %s2301_s14  ;;  %v2108_v8 = vld [vmem:[%s2900_s8 + $0x1c] sm:$0xf0]  ;;  %v2119_v25 = vld [vmem:[%s2900_s8 + $0x74] sm:$0xf0] }
  0x38   : > { %966 = vmatpush.bf16.msra.mxu1 %v2045_v29 }
  0x39   : > { %979 = vmatpush.bf16.msra.mxu2 %v2053_v30 }
  0x3a   : > { %992 = vmatpush.bf16.msra.mxu3 %v2061_v31  ;;  %954 = vmatmul.bf16.vlgmr.msra.gmra.mxu0 %v422_v41 }
  0x3b   : > { %998 = vmatpush.bf16.msrb.mxu0 %v2076_v32  ;;  %967 = vmatmul.bf16.vlgmr.msra.gmra.mxu1 %v423_v43 }
  0x3c   : > { %1011 = vmatpush.bf16.msrb.mxu1 %v2084_v35  ;;  %980 = vmatmul.bf16.vlgmr.msra.gmra.mxu2 %v424_v40 }
  0x3d   : > { %1024 = vmatpush.bf16.msrb.mxu2 %v2092_v38  ;;  %993 = vmatmul.bf16.vlgmr.msra.gmra.mxu3 %v425_v42 }
  0x3e   : > { %1037 = vmatpush.bf16.msrb.mxu3 %v2100_v39 }
  0x3f   : > { %999 = vmatpush.bf16.msrb.mxu0 %v2075_v44 }
  0x40   : > { %1012 = vmatpush.bf16.msrb.mxu1 %v2083_v45 }
  0x41   : > { %1025 = vmatpush.bf16.msrb.mxu2 %v2091_v46  ;;  %v2103_v46 = vld [vmem:[%s2898_s6] sm:$0xff] }
  0x42   : > { %1038 = vmatpush.bf16.msrb.mxu3 %v2099_v47  ;;  %v2169_v47 = vld [vmem:[%s2896_s4] ss:$0 sm:$0xff] }
  0x43   : > { %1000 = vmatpush.bf16.msrb.mxu0 %v2074_v48 }
  0x44   : > { %1013 = vmatpush.bf16.msrb.mxu1 %v2082_v49 }
  0x45   : > { %1026 = vmatpush.bf16.msrb.mxu2 %v2090_v50 }
  0x46   : > { %1039 = vmatpush.bf16.msrb.mxu3 %v2098_v51 }
  0x47   : > { %1001 = vmatpush.bf16.msrb.mxu0 %v2073_v52 }
  0x48   : > { %1014 = vmatpush.bf16.msrb.mxu1 %v2081_v53 }
  0x49   : > { %1027 = vmatpush.bf16.msrb.mxu2 %v2089_v54 }
  0x4a   : > { %1040 = vmatpush.bf16.msrb.mxu3 %v2097_v55 }
  0x4b   : > { %1002 = vmatpush.bf16.msrb.mxu0 %v2072_v56 }
  0x4c   : > { %1015 = vmatpush.bf16.msrb.mxu1 %v2080_v57 }
  0x4d   : > { %1028 = vmatpush.bf16.msrb.mxu2 %v2088_v58 }
  0x4e   : > { %1041 = vmatpush.bf16.msrb.mxu3 %v2096_v59  ;;  %v1983_v59 = vld [vmem:[%s2900_s8 + $0x40] sm:$0xf] }
  0x4f   : > { %1003 = vmatpush.bf16.msrb.mxu0 %v2071_v60  ;;  %v2116_v60 = vld [vmem:[%s2900_s8 + $0x5c] sm:$0xf0] }
  0x50   : > { %1016 = vmatpush.bf16.msrb.mxu1 %v2079_v61  ;;  %v2112_v61 = vld [vmem:[%s2900_s8 + $0x44] sm:$0xf] }
  0x51   : > { %1029 = vmatpush.bf16.msrb.mxu2 %v2087_v62  ;;  %v1984_v62 = vor.u32 %v2116_v60, %v1983_v59 }
  0x52   : > { %1042 = vmatpush.bf16.msrb.mxu3 %v2095_v63  ;;  %v1985_v63 = vld [vmem:[%s2900_s8 + $0x60] sm:$0xf0] }
  0x53   : > { %1004 = vmatpush.bf16.msrb.mxu0 %v2070_v0  ;;  %v1991_v0 = vld [vmem:[%s2900_s8 + $0x48] sm:$0xf] }
  0x54   : > { %1017 = vmatpush.bf16.msrb.mxu1 %v2078_v1  ;;  %v2117_v1 = vld [vmem:[%s2900_s8 + $0x64] sm:$0xf0] }
  0x55   : > { %1030 = vmatpush.bf16.msrb.mxu2 %v2086_v2  ;;  %v1988_v2 = vor.u32 %v2112_v61, %v1985_v63 }
  0x56   : > { %1043 = vmatpush.bf16.msrb.mxu3 %v2094_v3  ;;  %v1992_v3 = vor.u32 %v2117_v1, %v1991_v0 }
  0x57   : > { %1005 = vmatpush.bf16.msrb.mxu0 %v2069_v4  ;;  %v2113_v4 = vld [vmem:[%s2900_s8 + $0x4c] sm:$0xf] }
  0x58   : > { %1018 = vmatpush.bf16.msrb.mxu1 %v2077_v5  ;;  %v1993_v5 = vld [vmem:[%s2900_s8 + $0x68] sm:$0xf0] }
  0x59   : > { %1031 = vmatpush.bf16.msrb.mxu2 %v2085_v6  ;;  %v1951_v6 = vld [vmem:[%s2900_s8] sm:$0xf]  ;;  %v1996_v7 = vor.u32 %v2113_v4, %v1993_v5 }
  0x5a   : > { %1044 = vmatpush.bf16.msrb.mxu3 %v2093_v9  ;;  %1006 = vmatmul.bf16.vlgmr.msrb.gmra.mxu0 %v426_v12  ;;  %v2104_v9 = vld [vmem:[%s2900_s8 + $0x4] sm:$0xf]  ;;  %v1952_v11 = vor.u32 %v2108_v8, %v1951_v6 }
  0x5b   : > { %1019 = vmatmul.bf16.vlgmr.msrb.gmra.mxu1 %v427_v13  ;;  %1082 = vmatpush.bf16.msra.mxu0 %v2102_v16  ;;  %v1956_v12 = vor.u32 %v2104_v9, %v1953_v10  ;;  %v1959_v13 = vld [vmem:[%s2900_s8 + $0x8] sm:$0xf] }
  0x5c   : > { %1032 = vmatmul.bf16.vlgmr.msrb.gmra.mxu2 %v428_v14  ;;  %1127 = vmatpush.bf16.msra.mxu1 %v2103_v46  ;;  %v2109_v14 = vld [vmem:[%s2900_s8 + $0x24] sm:$0xf0] }
  0x5d   : > { %1045 = vmatmul.bf16.vlgmr.msrb.gmra.mxu3 %v429_v15  ;;  %1258 = vmatpush.bf16.msra.mxu2 %v1984_v62  ;;  %v2105_v15 = vld [vmem:[%s2900_s8 + $0xc] sm:$0xf]  ;;  %v1960_v16 = vor.u32 %v2109_v14, %v1959_v13 }
  0x5e   : > { %1271 = vmatpush.bf16.msra.mxu3 %v1988_v2 }
  0x5f   : > { %1083 = vmatpush.bf16.msra.mxu0 %v2101_v22 }
  0x60   : > { %1297 = vmatpush.bf16.msrb.mxu1 %v1996_v7 }
  0x61   : > { %1259 = vmatpush.bf16.msra.mxu2 %v1952_v11 }
  0x62   : > { %1272 = vmatpush.bf16.msra.mxu3 %v1956_v12 }
  0x63   : > { %1284 = vmatpush.bf16.msrb.mxu0 %v1992_v3 }
  0x67   : > { %1285 = vmatpush.bf16.msrb.mxu0 %v1960_v16 }
  0xa9   : > { %v1095_v53 = vpop.permute.xlu0 %1094 }
  0xb7   : > { %v955_v17 = vpop.f32.mrf.mxu0 }
  0xb8   : > { %v968_v18 = vpop.f32.mrf.mxu1  ;;  %v956_v28 = vadd.f32 %v2168_v24, %v955_v17  ;;  %v1961_v17 = vld [vmem:[%s2900_s8 + $0x28] sm:$0xf0]  ;;  %v2007_v24 = vld [vmem:[%s2900_s8 + $0x58] sm:$0xf] }
  0xba   : > { %v969_v29 = vadd.f32 %v968_v18, %v956_v28  ;;  %v1964_v18 = vor.u32 %v2105_v15, %v1961_v17  ;;  %v2115_v28 = vld [vmem:[%s2900_s8 + $0x5c] sm:$0xf] }
  0xbc   : > { %1298 = vmatpush.bf16.msrb.mxu1 %v1964_v18 }
  0xbf   : > { %v981_v19 = vpop.f32.mrf.mxu2  ;;  %v957_v21 = vpop.f32.mrf.mxu0 }
  0xc0   : > { %v994_v20 = vpop.f32.mrf.mxu3  ;;  %v970_v23 = vpop.f32.mrf.mxu1  ;;  %v982_v30 = vadd.f32 %v981_v19, %v969_v29  ;;  %v1999_v19 = vld [vmem:[%s2900_s8 + $0x50] sm:$0xf]  ;;  %v2114_v21 = vld [vmem:[%s2900_s8 + $0x54] sm:$0xf]  ;;  %v2009_v29 = vld [vmem:[%s2900_s8 + $0x78] sm:$0xf0] }
  0xc1   : > { %v2001_v23 = vld [vmem:[%s2900_s8 + $0x70] sm:$0xf0] }
  0xc2   : > { %v995_v31 = vadd.f32 %v994_v20, %v982_v30  ;;  %v2118_v20 = vld [vmem:[%s2900_s8 + $0x6c] sm:$0xf0] }
  0xc3   : > { %v2000_v22 = vor.u32 %v2118_v20, %v1999_v19  ;;  %v1967_v30 = vld [vmem:[%s2900_s8 + $0x10] sm:$0xf] }
  0xc5   : > { %1310 = vmatpush.bf16.msrb.mxu2 %v2000_v22 }
  0xc7   : > { %v983_v26 = vpop.f32.mrf.mxu2 }
  0xc8   : > { %v996_v27 = vpop.f32.mrf.mxu3  ;;  %v2004_v26 = vor.u32 %v2114_v21, %v2001_v23 }
  0xc9   : > { %v2008_v27 = vor.u32 %v2119_v25, %v2007_v24 }
  0xca   : > { %1323 = vmatpush.bf16.msrb.mxu3 %v2004_v26 }
  0xd7   : > { %v1007_v32 = vpop.f32.mrf.mxu0 }
  0xd8   : > { %v1020_v33 = vpop.f32.mrf.mxu1  ;;  %v1008_v34 = vadd.f32 %v1007_v32, %v995_v31  ;;  %v2012_v32 = vor.u32 %v2115_v28, %v2009_v29 }
  0xda   : > { %v1021_v35 = vadd.f32 %v1020_v33, %v1008_v34  ;;  %v2110_v33 = vld [vmem:[%s2900_s8 + $0x2c] sm:$0xf0]  ;;  %v2106_v34 = vld [vmem:[%s2900_s8 + $0x14] sm:$0xf] }
  0xdf   : > { %v1033_v36 = vpop.f32.mrf.mxu2  ;;  %v1009_v39 = vpop.f32.mrf.mxu0 }
  0xe0   : > { %v1046_v37 = vpop.f32.mrf.mxu3  ;;  %v1034_v38 = vadd.f32 %v1033_v36, %v1021_v35  ;;  %v1022_v40 = vpop.f32.mrf.mxu1  ;;  %v1969_v35 = vld [vmem:[%s2900_s8 + $0x30] sm:$0xf0]  ;;  %v1968_v36 = vor.u32 %v2110_v33, %v1967_v30  ;;  %v2111_v39 = vld [vmem:[%s2900_s8 + $0x34] sm:$0xf0] }
  0xe1   : > { %v2107_v40 = vld [vmem:[%s2900_s8 + $0x1c] sm:$0xf] }
  0xe2   : > { %v1047_v41 = vadd.f32 %v1046_v37, %v1034_v38  ;;  %v1972_v37 = vor.u32 %v2106_v34, %v1969_v35  ;;  %v1975_v38 = vld [vmem:[%s2900_s8 + $0x18] sm:$0xf]  ;;  %1311 = vmatpush.bf16.msrb.mxu2 %v1968_v36 }
  0xe4   : > { %v1050_v42 = vmax.f32 %v1047_v41, 0.0  ;;  %v1976_v41 = vor.u32 %v2111_v39, %v1975_v38  ;;  %1324 = vmatpush.bf16.msrb.mxu3 %v1972_v37 }
  0xe6   : > { %v1051_v43 = vpack.c.bf16 %v1050_v42, %v1050_v42  ;;  %v1977_v42 = vld [vmem:[%s2900_s8 + $0x38] sm:$0xf0] }
  0xe7   : > { %v1035_v44 = vpop.f32.mrf.mxu2 }
  0xe8   : > { %v1048_v45 = vpop.f32.mrf.mxu3  ;;  %1943 = vmatmul.msk.bf16.vlgmr.msra.gmra.mxu0 %vm1072_vm0, %v1051_v43  ;;  %v1980_v43 = vor.u32 %v2107_v40, %v1977_v42 }
  0xe9   : > { %1336 = vmatpush.bf16.msra.mxu0 %v2008_v27 }
  0xed   : > { %1337 = vmatpush.bf16.msra.mxu0 %v1976_v41 }
 0x165   : > { %v1085_v48 = vpop.f32.mrf.mxu0 }
 0x166   : > { %v2643_v49 = vadd.f32 %v2169_v47, %v1085_v48  ;;  %v2170_v48 = vld [vmem:[%s2899_s7] ss:$0 sm:$0xff] }
 0x168   : > { %v1089_v50 = vmul.f32 0.5, %v2643_v49 }
 0x16a   : > { %v1090_v51 = vmul.f32 1.442695, %v1089_v50 }
 0x16c   : > { %2171 = vpow2.f32 %v1090_v51 }
 0x16d   : > { %v1087_v52 = vpop.f32.mrf.mxu0 }
 0x172   : > { %v2172_v54 = vpop.eup %2171 }
 0x173   : > { %v1097_v55 = vmul.f32 %v2172_v54, %v1095_v53  ;;  %1517 = vrot.lane.b32.xlu1 %v2172_v54, %s2301_s14 }
 0x175   : > { %1099 = vrot.lane.b32.xlu0 %v1097_v55, %s2302_s23  ;;  %s2219_s23 = sshra.s32 %s1566_s19, 4  ;;  %s2220_s23 = int_to_ptr.hbm [resolvable:$true] %s2219_s23 }
 0x176   : > { %p2226_p0 = scmp.lt.s32.totalorder %s2220_s23, %s2903_s11 }
 0x1e5   : > { %v1518_v31 = vpop.permute.xlu1 %1517 }
 0x1e6   : > { %v1524_v44 = vsel %vm1072_vm0, %v2643_v49, %v1518_v31 }
 0x1e7   : > { %v1100_v56 = vpop.permute.xlu0 %1099 }
 0x1e8   : > { %v1102_v57 = vadd.f32 %v1100_v56, %v2643_v49 }
 0x1ea   : > { %v1103_v58 = vpack.c.bf16 %v1102_v57, %v1102_v57  ;;  %1521 = vrot.lane.b32.xlu1 %v1102_v57, %s2303_s16  ;;  %s2745_s16 = sand.u32 1, %s2291_s18  }
 0x1eb   : > { %s1675_s22 = sshll.u32 %s2745_s16, 3  ;;  %s1536_s25 = scalar_lea.sflag [#allocation5], %s2745_s16 }
 0x1ec   : > { %1948 = vmatmul.msk.bf16.vlgmr.msra.gmra.mxu1 %vm1116_vm1, %v1103_v58  ;;  %s403_s24 = scalar_lea.vmem [#allocation4], %s1675_s22  ;;  %s2221_s22 = scalar_lea.hbm %s2220_s23, 8 }
 0x1ed   : > { %1349 = vmatpush.bf16.msra.mxu1 %v2012_v32  ;;  %s1563_s13 = sshll.u32 %s403_s24, 4  ;;  %p2222_p11 = scmp.ne.s32.totalorder %s2220_s23, %s2221_s22  ;;  %s1564_s13 = int_to_ptr.vmem [resolvable:$true] %s1563_s13 }
 0x1ee   : > { %p2227_p1 = scmp.lt.s32.totalorder %s2225_s0, %s2221_s22 }
 0x1ef   : > { %p2223_p12 = pnand %p2222_p11, %p2402_p5 }
 0x1f0   : > { %p2228_p2 = por %p2227_p1, %p2226_p0 }
 0x1f1   : > { %1350 = vmatpush.bf16.msra.mxu1 %v1980_v43  ;;  %p2224_p13 = pneg %p2223_p12 }
 0x1f3   : > { %p2229_p3 = pnand %p2228_p2, %p2224_p13 }
 0x25c   : > { %v1522_v45 = vpop.permute.xlu1 %1521 }
 0x25d   : > { %v1526_v46 = vsel %vm1525_vm2, %v1524_v44, %v1522_v45 }
 0x25e   : > { %v1528_v47 = vsel %vm1527_vm3, %v1526_v46, 0.0 }
 0x25f   : > { %1529 = vst [vmem:[%s403_s24] sm:$0xff] %v1528_v47 }
 0x269   : > { %v1129_v50 = vpop.f32.mrf.mxu1 }
 0x26a   : > { %v1130_v51 = vadd.f32 %v2170_v48, %v1129_v50 }
 0x26c   : > { %v1133_v52 = vmax.f32 %v1130_v51, 0.0 }
 0x26e   : > { %v1134_v53 = vpack.c.bf16 %v1133_v52, %v1133_v52 }
 0x270   : > { %2013 = vmatmul.msk.bf16.vlgmr.msra.gmra.mxu2 %vm1072_vm0, %v1134_v53  ;;  %2014 = vmatmul.msk.bf16.vlgmr.msra.gmra.mxu3 %vm1072_vm0, %v1134_v53 }
 0x271   : > { %2015 = vmatmul.msk.bf16.vlgmr.msrb.gmra.mxu0 %vm1072_vm0, %v1134_v53  ;;  %2016 = vmatmul.msk.bf16.vlgmr.msrb.gmra.mxu1 %vm1072_vm0, %v1134_v53  ;;  %v1131_v49 = vpop.f32.mrf.mxu1 }
 0x280   : > { %2017 = vmatmul.msk.bf16.vlgmr.msrb.gmra.mxu2 %vm1072_vm0, %v1134_v53  ;;  %2018 = vmatmul.msk.bf16.vlgmr.msrb.gmra.mxu3 %vm1072_vm0, %v1134_v53 }
 0x281   : > { %2019 = vmatmul.msk.bf16.vlgmr.msra.gmra.mxu0 %vm1072_vm0, %v1134_v53  ;;  %2020 = vmatmul.msk.bf16.vlgmr.msra.gmra.mxu1 %vm1072_vm0, %v1134_v53 }
 0x282   : > { %2232 = shalt.err (!%p2229_p3)
}
 0x283   : > { %2122 = dma.vmem_to_hbm [thread:$0]  (%p2402_p5), %s1564_s13, 128, %s1566_s19, %s1536_s25   ;;  %v2779_v54 = vld [vmem:[%s2901_s9] sm:$0xff] }
 0x284   : > { %v1155_v55 = vperm.slane %v2779_v54, 2  ;;  %v1156_v56 = vperm.slane %v2779_v54, 3  ;;  %v1153_v61 = vperm.slane %v2779_v54, 0  ;;  %v1154_v62 = vperm.slane %v2779_v54, 1  ;;  %s1674_s0 = sshll.u32 %s2745_s16, 6  ;;  %s2120_s13 = sshll.u32 %s2385_s21, 6 }
 0x285   : > { %v1159_v15 = vperm.slane %v2779_v54, 6  ;;  %v1160_v16 = vperm.slane %v2779_v54, 7  ;;  %v1157_v27 = vperm.slane %v2779_v54, 4  ;;  %v1158_v31 = vperm.slane %v2779_v54, 5  ;;  %s2823_s1 = scalar_lea.vmem [#allocation2], %s1674_s0  ;;  %s1547_s15 = scalar_lea.hbm %s2902_s10, %s2120_s13 }
 0x286   : > { %s1549_s19 = sshll.u32 %s2823_s1, 4  ;;  %s1551_s25 = sshll.u32 %s1547_s15, 4  ;;  %s1550_s19 = int_to_ptr.vmem [resolvable:$true] %s1549_s19  ;;  %s1552_s25 = int_to_ptr.hbm [resolvable:$true] %s1551_s25 }
 0x287   : > { %s1531_s23 = scalar_lea.sflag [#allocation3], %s2745_s16  ;;  %s2247_s22 = sshra.s32 %s1552_s25, 4  ;;  %s2248_s22 = int_to_ptr.hbm [resolvable:$true] %s2247_s22 }
 0x288   : > { %s2249_s26 = scalar_lea.hbm %s2248_s22, 64  ;;  %s2253_s12 = scalar_lea.hbm %s2902_s10, 128 }
 0x289   : > { %p2250_p4 = scmp.ne.s32.totalorder %s2248_s22, %s2249_s26  ;;  %p2254_p9 = scmp.lt.s32.totalorder %s2248_s22, %s2902_s10 }
 0x28a   : > { %p2255_p10 = scmp.lt.s32.totalorder %s2253_s12, %s2249_s26 }
 0x28b   : > { %p2251_p7 = pnand %p2250_p4, %p2402_p5 }
 0x28c   : > { %p2256_p11 = por %p2255_p10, %p2254_p9 }
 0x28d   : > { %p2252_p8 = pneg %p2251_p7 }
 0x28f   : > { %p2257_p12 = pnand %p2256_p11, %p2252_p8 }
 0x2ee   : > { %v1287_v57 = vpop.f32.mrf.mxu0  ;;  %v1300_v58 = vpop.f32.mrf.mxu1 }
 0x2ef   : > { %v1288_v59 = vadd.f32 %v1287_v57, %v1155_v55  ;;  %v1301_v60 = vadd.f32 %v1300_v58, %v1156_v56 }
 0x2f1   : > { %v2023_v63 = vmul.f32 -1.442695, %v1288_v59  ;;  %v2024_v0 = vmul.f32 -1.442695, %v1301_v60 }
 0x2f3   : > { %2173 = vpow2.f32 %v2023_v63  ;;  %v1261_v1 = vpop.f32.mrf.mxu2  ;;  %v1274_v2 = vpop.f32.mrf.mxu3 }
 0x2f4   : > { %2175 = vpow2.f32 %v2024_v0  ;;  %v1262_v3 = vadd.f32 %v1261_v1, %v1153_v61  ;;  %v1275_v4 = vadd.f32 %v1274_v2, %v1154_v62 }
 0x2f6   : > { %v2021_v5 = vmul.f32 -1.442695, %v1262_v3  ;;  %v2022_v6 = vmul.f32 -1.442695, %v1275_v4  ;;  %v1289_v7 = vpop.f32.mrf.mxu0  ;;  %v1302_v8 = vpop.f32.mrf.mxu1 }
 0x2f8   : > { %2177 = vpow2.f32 %v2021_v5 }
 0x2f9   : > { %v2174_v9 = vpop.eup %2173  ;;  %2179 = vpow2.f32 %v2022_v6 }
 0x2fa   : > { %v2176_v10 = vpop.eup %2175  ;;  %v1382_v11 = vadd.f32 1.0, %v2174_v9 }
 0x2fb   : > { %v2785_v12 = vadd.f32 1.0, %v2176_v10  ;;  %v1263_v13 = vpop.f32.mrf.mxu2  ;;  %v1276_v14 = vpop.f32.mrf.mxu3 }
 0x2fc   : > { %2181 = vrcp.f32 %v1382_v11  ;;  %v1427_v22 = vand.u32 2147483647, %v1382_v11  ;;  %v1429_v23 = vand.u32 2147483648, %v1382_v11  ;;  %vm1423_vm4 = vweird.f32 %v1382_v11 }
 0x2fd   : > { %2183 = vrcp.f32 %v2785_v12  ;;  %v1442_v29 = vand.u32 2147483647, %v2785_v12  ;;  %v1444_v30 = vand.u32 2147483648, %v2785_v12  ;;  %vm1438_vm6 = vweird.f32 %v2785_v12 }
 0x2fe   : > { %v2178_v17 = vpop.eup %2177  ;;  %v1339_v18 = vpop.f32.mrf.mxu0  ;;  %vm2800_vm5 = vcmp.eq.f32.partialorder %v1427_v22, 8.507059e+37  ;;  %v1430_v37 = vor.u32 1.1754944e-38, %v1429_v23 }
 0x2ff   : > { %v1352_v19 = vpop.f32.mrf.mxu1  ;;  %v2180_v20 = vpop.eup %2179  ;;  %v2790_v21 = vadd.f32 1.0, %v2178_v17  ;;  %v1340_v25 = vadd.f32 %v1339_v18, %v1159_v15  ;;  %vm2806_vm7 = vcmp.eq.f32.partialorder %v1442_v29, 8.507059e+37  ;;  %v1445_v45 = vor.u32 1.1754944e-38, %v1444_v30 }
 0x300   : > { %v2792_v24 = vadd.f32 1.0, %v2180_v20  ;;  %v1353_v26 = vadd.f32 %v1352_v19, %v1160_v16 }
 0x301   : > { %2185 = vrcp.f32 %v2790_v21  ;;  %v2027_v40 = vmul.f32 -1.442695, %v1340_v25  ;;  %v1397_v56 = vand.u32 2147483647, %v2790_v21  ;;  %v1399_v57 = vand.u32 2147483648, %v2790_v21 }
 0x302   : > { %v2182_v28 = vpop.eup %2181  ;;  %2187 = vrcp.f32 %v2792_v24  ;;  %v2028_v41 = vmul.f32 -1.442695, %v1353_v26  ;;  %v1414_v0 = vand.u32 2147483648, %v2792_v24  ;;  %v1412_v9 = vand.u32 2147483647, %v2792_v24 }
 0x303   : > { %v2184_v32 = vpop.eup %2183  ;;  %v1419_v33 = vmul.f32 %v2182_v28, %v1382_v11  ;;  %v1313_v34 = vpop.f32.mrf.mxu2  ;;  %vm1424_vm8 = vweird.f32 %v2182_v28  ;;  %2189 = vpow2.f32 %v2027_v40  ;;  %vm1393_vm14 = vweird.f32 %v2790_v21 }
 0x304   : > { %v1326_v35 = vpop.f32.mrf.mxu3  ;;  %v1434_v38 = vmul.f32 %v2184_v32, %v2785_v12  ;;  %v1314_v42 = vadd.f32 %v1313_v34, %v1157_v27  ;;  %vm1439_vm9 = vweird.f32 %v2184_v32  ;;  %2191 = vpow2.f32 %v2028_v41  ;;  %vm1425_vm10 = vmor %vm1423_vm4, %vm1424_vm8 }
 0x305   : > { %v1420_v39 = vsub.f32 1.0, %v1419_v33  ;;  %v1327_v46 = vadd.f32 %v1326_v35, %v1158_v31  ;;  %vm1440_vm11 = vmor %vm1438_vm6, %vm1439_vm9  ;;  %v1400_v13 = vor.u32 1.1754944e-38, %v1399_v57  ;;  %vm1408_vm0 = vweird.f32 %v2792_v24 }
 0x306   : > { %v1435_v43 = vsub.f32 1.0, %v1434_v38  ;;  %v1341_v47 = vpop.f32.mrf.mxu0  ;;  %v2025_v52 = vmul.f32 -1.442695, %v1314_v42  ;;  %vm1398_vm1 = vcmp.eq.f32.partialorder %v1397_v56, 8.507059e+37  ;;  %v1415_v18 = vor.u32 1.1754944e-38, %v1414_v0 }
 0x307   : > { %v1354_v48 = vpop.f32.mrf.mxu1  ;;  %v2186_v50 = vpop.eup %2185  ;;  %v1421_v51 = vmul.f32 %v2182_v28, %v1420_v39  ;;  %v2026_v61 = vmul.f32 -1.442695, %v1327_v46  ;;  %vm1413_vm3 = vcmp.eq.f32.partialorder %v1412_v9, 8.507059e+37 }
 0x308   : > { %v2188_v53 = vpop.eup %2187  ;;  %v1436_v49 = vmul.f32 %v2184_v32, %v1435_v43  ;;  %v1389_v54 = vmul.f32 %v2186_v50, %v2790_v21  ;;  %2193 = vpow2.f32 %v2025_v52  ;;  %vm1394_vm12 = vweird.f32 %v2186_v50 }
 0x309   : > { %v1422_v55 = vadd.f32 %v2182_v28, %v1421_v51  ;;  %v1404_v58 = vmul.f32 %v2188_v53, %v2792_v24  ;;  %2195 = vpow2.f32 %v2026_v61  ;;  %v2190_v6 = vpop.eup %2189  ;;  %vm1409_vm13 = vweird.f32 %v2188_v53  ;;  %vm1395_vm15 = vmor %vm1393_vm14, %vm1394_vm12 }
 0x30a   : > { %v1437_v59 = vadd.f32 %v2184_v32, %v1436_v49  ;;  %v1390_v60 = vsub.f32 1.0, %v1389_v54  ;;  %v2192_v10 = vpop.eup %2191  ;;  %v1386_v12 = vadd.f32 1.0, %v2190_v6  ;;  %vm1410_vm2 = vmor %vm1408_vm0, %vm1409_vm13 }
 0x30b   : > { %v1426_v62 = vsel %vm1425_vm10, %v2182_v28, %v1422_v55  ;;  %v1405_v63 = vsub.f32 1.0, %v1404_v58  ;;  %v1315_v1 = vpop.f32.mrf.mxu2  ;;  %v1387_v15 = vadd.f32 1.0, %v2192_v10 }
 0x30c   : > { %v1328_v2 = vpop.f32.mrf.mxu3  ;;  %v1431_v3 = vsel %vm2800_vm5, %v1430_v37, %v1426_v62  ;;  %v1441_v4 = vsel %vm1440_vm11, %v2184_v32, %v1437_v59  ;;  %v1391_v5 = vmul.f32 %v2186_v50, %v1390_v60  ;;  %2197 = vrcp.f32 %v1386_v12 }
 0x30d   : > { %1510 = vst [vmem:[%s2823_s1 + $0x10] sm:$0xff] %v1431_v3  ;;  %v1446_v7 = vsel %vm2806_vm7, %v1445_v45, %v1441_v4  ;;  %v1406_v8 = vmul.f32 %v2188_v53, %v1405_v63  ;;  %2199 = vrcp.f32 %v1387_v15  ;;  %v1487_v28 = vand.u32 2147483647, %v1386_v12 }
 0x30e   : > { %1511 = vst [vmem:[%s2823_s1 + $0x18] sm:$0xff] %v1446_v7  ;;  %v1392_v11 = vadd.f32 %v2186_v50, %v1391_v5  ;;  %v2194_v16 = vpop.eup %2193  ;;  %v1489_v31 = vand.u32 2147483648, %v1386_v12  ;;  %v1502_v32 = vand.u32 2147483647, %v1387_v15  ;;  %v1504_v34 = vand.u32 2147483648, %v1387_v15 }
 0x30f   : > { %v1407_v14 = vadd.f32 %v2188_v53, %v1406_v8  ;;  %v2196_v21 = vpop.eup %2195  ;;  %v1384_v23 = vadd.f32 1.0, %v2194_v16  ;;  %vm1483_vm4 = vweird.f32 %v1386_v12  ;;  %vm2839_vm6 = vcmp.eq.f32.partialorder %v1487_v28, 8.507059e+37 }
 0x310   : > { %v1396_v17 = vsel %vm1395_vm15, %v2186_v50, %v1392_v11  ;;  %v2836_v25 = vadd.f32 1.0, %v2196_v21  ;;  %vm1498_vm7 = vweird.f32 %v1387_v15  ;;  %v1490_v42 = vor.u32 1.1754944e-38, %v1489_v31 }
 0x311   : > { %v1401_v19 = vsel %vm1398_vm1, %v1400_v13, %v1396_v17  ;;  %v1411_v20 = vsel %vm1410_vm2, %v2188_v53, %v1407_v14  ;;  %2201 = vrcp.f32 %v1384_v23  ;;  %vm2844_vm9 = vcmp.eq.f32.partialorder %v1502_v32, 8.507059e+37 }
 0x312   : > { %1508 = vst [vmem:[%s2823_s1] sm:$0xff] %v1401_v19  ;;  %v1416_v22 = vsel %vm1413_vm3, %v1415_v18, %v1411_v20  ;;  %v2198_v24 = vpop.eup %2197  ;;  %2203 = vrcp.f32 %v2836_v25  ;;  %v1505_v46 = vor.u32 1.1754944e-38, %v1504_v34  ;;  %v1457_v48 = vand.u32 2147483647, %v1384_v23 }
 0x313   : > { %1509 = vst [vmem:[%s2823_s1 + $0x8] sm:$0xff] %v1416_v22  ;;  %v2200_v26 = vpop.eup %2199  ;;  %v1479_v27 = vmul.f32 %v2198_v24, %v1386_v12  ;;  %vm1484_vm5 = vweird.f32 %v2198_v24  ;;  %v1459_v51 = vand.u32 2147483648, %v1384_v23  ;;  %v1474_v53 = vand.u32 2147483648, %v2836_v25 }
 0x314   : > { %v1494_v29 = vmul.f32 %v2200_v26, %v1387_v15  ;;  %vm1499_vm8 = vweird.f32 %v2200_v26  ;;  %vm1485_vm10 = vmor %vm1483_vm4, %vm1484_vm5  ;;  %v1472_v58 = vand.u32 2147483647, %v2836_v25  ;;  %vm1453_vm14 = vweird.f32 %v1384_v23 }
 0x315   : > { %v1480_v30 = vsub.f32 1.0, %v1479_v27  ;;  %vm1500_vm11 = vmor %vm1498_vm7, %vm1499_vm8  ;;  %v1460_v60 = vor.u32 1.1754944e-38, %v1459_v51  ;;  %vm1468_vm0 = vweird.f32 %v2836_v25  ;;  %vm1458_vm1 = vcmp.eq.f32.partialorder %v1457_v48, 8.507059e+37 }
 0x316   : > { %v1495_v33 = vsub.f32 1.0, %v1494_v29  ;;  %v1475_v63 = vor.u32 1.1754944e-38, %v1474_v53  ;;  %vm1473_vm3 = vcmp.eq.f32.partialorder %v1472_v58, 8.507059e+37 }
 0x317   : > { %v2202_v35 = vpop.eup %2201  ;;  %v1481_v36 = vmul.f32 %v2198_v24, %v1480_v30 }
 0x318   : > { %v2204_v38 = vpop.eup %2203  ;;  %v1496_v39 = vmul.f32 %v2200_v26, %v1495_v33  ;;  %v1449_v40 = vmul.f32 %v2202_v35, %v1384_v23  ;;  %vm1454_vm12 = vweird.f32 %v2202_v35 }
 0x319   : > { %v1482_v41 = vadd.f32 %v2198_v24, %v1481_v36  ;;  %v1464_v44 = vmul.f32 %v2204_v38, %v2836_v25  ;;  %vm1469_vm13 = vweird.f32 %v2204_v38  ;;  %vm1455_vm15 = vmor %vm1453_vm14, %vm1454_vm12 }
 0x31a   : > { %v1497_v45 = vadd.f32 %v2200_v26, %v1496_v39  ;;  %v1450_v47 = vsub.f32 1.0, %v1449_v40  ;;  %vm1470_vm2 = vmor %vm1468_vm0, %vm1469_vm13 }
 0x31b   : > { %v1486_v50 = vsel %vm1485_vm10, %v2198_v24, %v1482_v41  ;;  %v1465_v52 = vsub.f32 1.0, %v1464_v44 }
 0x31c   : > { %v1491_v49 = vsel %vm2839_vm6, %v1490_v42, %v1486_v50  ;;  %v1501_v54 = vsel %vm1500_vm11, %v2200_v26, %v1497_v45  ;;  %v1451_v55 = vmul.f32 %v2202_v35, %v1450_v47 }
 0x31d   : > { %1514 = vst [vmem:[%s2823_s1 + $0x30] sm:$0xff] %v1491_v49  ;;  %v1506_v56 = vsel %vm2844_vm9, %v1505_v46, %v1501_v54  ;;  %v1466_v57 = vmul.f32 %v2204_v38, %v1465_v52 }
 0x31e   : > { %1515 = vst [vmem:[%s2823_s1 + $0x38] sm:$0xff] %v1506_v56  ;;  %v1452_v59 = vadd.f32 %v2202_v35, %v1451_v55 }
 0x31f   : > { %v1467_v61 = vadd.f32 %v2204_v38, %v1466_v57 }
 0x320   : > { %v1456_v62 = vsel %vm1455_vm15, %v2202_v35, %v1452_v59 }
 0x321   : > { %v1461_v0 = vsel %vm1458_vm1, %v1460_v60, %v1456_v62  ;;  %v1471_v1 = vsel %vm1470_vm2, %v2204_v38, %v1467_v61 }
 0x322   : > { %1512 = vst [vmem:[%s2823_s1 + $0x20] sm:$0xff] %v1461_v0  ;;  %v1476_v2 = vsel %vm1473_vm3, %v1475_v63, %v1471_v1 }
 0x323   : > { %1513 = vst [vmem:[%s2823_s1 + $0x28] sm:$0xff] %v1476_v2 }
 0x324   : > { %2260 = shalt.err (!%p2257_p12)
}
 0x325   : > { %2121 = dma.vmem_to_hbm [thread:$0]  (%p2402_p5), %s1550_s19, 1024, %s1552_s25, %s1531_s23  }
 0x326 PF: > { %p2132_p13 = scmp.ge.s32.totalorder %s2299_s20, 2  ;;  %s1577_s16 = sand.u32 1, %s2287_s17  }
 0x327   : > { %s1578_s1 = scalar_lea.sflag [#allocation3], %s1577_s16 }
 0x328   : > { %p2126_p0 = pnand %p2132_p13, %p2406_p6 }
 0x32a   : > { %p2127_p1 = pneg %p2126_p0 }
 0x32c   : > { %2278 = dma.done.wait (%p2127_p1), %s1578_s1, 1024  }
 0x32d   : > { %2280 = vsyncadd (%p2127_p1), %s1578_s1, 4294966272  ;;  %s1588_s13 = scalar_lea.sflag [#allocation5], %s1577_s16 }
 0x32e   : > { %2282 = dma.done.wait (%p2127_p1), %s1588_s13, 128  }
 0x32f   : > { %2284 = vsyncadd (%p2127_p1), %s1588_s13, 4294967168  ;;  %s2924_s20 = sld [smem:[#allocation9_spill]]  ;;  %s2927_s17 = smov %s2291_s18 }
 0x330   : > { %s2925_s21 = sld [smem:[#allocation8_spill]] }
 0x331   : > { %s2926_s19 = sld [smem:[#allocation10_spill]] }
 0x335   : > { %p25_p5 = scmp.ge.s32.totalorder %s2924_s20, 4  }
 0x336   : > { %s2928_s18 = smov %s2925_s21 }
 0x337   :  { %27 = sbr.rel (!%p25_p5) target bundleno = 8 (0x8), region = 115 }
 0x33c   :  { %1594 = vsyncpa [#allocation3], 1 }
 0x33d   :  { %1596 = vsyncpa [#allocation3 + $0x1], 1 }
 0x33e   :  { %1597 = vsyncpa [#allocation5], 1 }
 0x33f   :  { %1599 = vsyncpa [#allocation5 + $0x1], 1 }

</bundles_post_ra>
